<compile_context>
chip_gen: v7x
topology: tpu7x:2x2x1
jax: 0.10.0
libtpu: 0.0.40
codegen_flags: <defaults>
</compile_context>

<pallas_src>
import math

import jax
import jax.numpy as jnp
from jax.experimental import pallas as pl
from jax.experimental.pallas import tpu as pltpu


_SELU_ALPHA = 1.6732632423543772
_SELU_SCALE = 1.0507009873554805
_LN_EPS = 1e-5
_NEG_BIG = -1e30


def _round_up(n, m):
    return ((n + m - 1) // m) * m


def _vmem_capacity_bytes():
    try:
        return int(pltpu.get_tpu_info().vmem_capacity_bytes)
    except Exception:
        return 64 * 1024 * 1024  # conservative (v7x per-TensorCore VMEM)


def _make_kernel(nmb_heads, d_true, c_true, c_pad):
    """Fused per-tile kernel. Heads are statically unrolled (they are chained)."""
    mask_cols = (c_true != c_pad)

    def kernel(x_ref, w_ref, b_ref, *o_refs):
        # x_ref : (TILE_B, D_pad)        f32  flattened input tile (padded lanes 0)
        # w_ref : (H, D_pad, C_pad)      bf16 LN-affine-folded W^T, zero-padded
        # b_ref : (H, 1, C_pad)          f32  folded biases, zero-padded
        # o_refs: H x (TILE_B, C_pad)    f32  per-head softmax outputs
        cur = x_ref[...].astype(jnp.float32)
        in_dim = d_true
        for h in range(nmb_heads):  # static unroll; heads are chained
            # --- LayerNorm over the true feature width.  Padded lanes of `cur`
            #     are exactly zero, so un-masked sums are already correct; the
            #     two reductions are independent (var = E[x^2] - mean^2) so the
            #     XLU can dual-issue them. ---
            inv_n = 1.0 / float(in_dim)
            s1 = jnp.sum(cur, axis=-1, keepdims=True)
            s2 = jnp.sum(cur * cur, axis=-1, keepdims=True)
            mean = s1 * inv_n
            var = jnp.maximum(s2 * inv_n - mean * mean, 0.0)
            xn = (cur - mean) * jax.lax.rsqrt(var + _LN_EPS)
            # xn is garbage on padded input lanes, but those weight rows are 0.

            # --- Linear on the MXU: bf16 inputs, f32 accumulation ---
            y = jnp.dot(xn.astype(jnp.bfloat16), w_ref[h],
                        preferred_element_type=jnp.float32)
            y = y + b_ref[h]

            # --- SELU (clamp exp arg so the unselected branch can't overflow) ---
            y = _SELU_SCALE * jnp.where(
                y > 0, y, _SELU_ALPHA * (jnp.exp(jnp.minimum(y, 0.0)) - 1.0))

            # --- Mask padded class columns AFTER SELU (SELU saturates ~-1.76,
            #     so a large-negative bias alone cannot zero their softmax mass).
            if mask_cols:
                col = jax.lax.broadcasted_iota(jnp.int32, y.shape, 1)
                y = jnp.where(col < c_true, y, _NEG_BIG)

            # --- Softmax over the class (lane) dim.  Exact reciprocal: this
            #     value feeds the next head's LayerNorm. ---
            m = jnp.max(y, axis=-1, keepdims=True)
            e = jnp.exp(y - m)
            inv = pl.reciprocal(jnp.sum(e, axis=-1, keepdims=True))
            p = e * inv

            o_refs[h][...] = p.astype(o_refs[h].dtype)
            cur = p                    # chained: next head consumes this output
            in_dim = c_true
    return kernel


def init_multi_prototypes_params(key, output_dim, n_classes, nmb_heads):
    """Deterministic parameter init matching the PyTorch module's __init__."""
    params = []
    for i in range(nmb_heads):
        key, wk = jax.random.split(key)
        in_dim = output_dim if i == 0 else n_classes
        # xavier_normal_ for Linear(in_dim -> n_classes)
        std = math.sqrt(2.0 / (in_dim + n_classes))
        w = jax.random.normal(wk, (n_classes, in_dim), dtype=jnp.float32) * std
        params.append(dict(
            gamma=jnp.ones((1, in_dim), jnp.float32),     # LayerNorm weight
            beta=jnp.zeros((1, in_dim), jnp.float32),     # LayerNorm bias
            w_t=w.T,                                      # (in_dim, n_classes)
            bias=jnp.zeros((1, n_classes), jnp.float32),  # Linear bias (zeroed)
        ))
    return params


def multi_prototypes_forward(x, params):
    """x: NCHW input. Returns list of per-head outputs (heads are chained)."""
    B = x.shape[0]
    x_flat = x.reshape(B, -1).astype(jnp.float32)   # nn.Flatten (row-major)
    D = x_flat.shape[1]
    H = len(params)
    C = params[0]["w_t"].shape[1]
    if H > 1:
        assert C == D, ("chained heads require n_classes == output_dim, exactly "
                        "as in the PyTorch module")

    D_pad = _round_up(D, 128)
    C_pad = _round_up(C, 128)

    # --- Fold LayerNorm affine into each head's linear layer; zero-pad to
    #     lane-dense (multiple-of-128) shapes. ---
    w_list, b_list = [], []
    in_dim, in_pad = D, D_pad
    for p in params:
        assert p["w_t"].shape[0] == in_dim
        w_fold = p["gamma"].reshape(-1, 1) * p["w_t"]          # (in_dim, C)
        b_fold = p["beta"] @ p["w_t"] + p["bias"]              # (1, C)
        w_list.append(jnp.zeros((in_pad, C_pad), jnp.float32)
                      .at[:in_dim, :C].set(w_fold))
        b_list.append(jnp.zeros((1, C_pad), jnp.float32).at[:, :C].set(b_fold))
        in_dim, in_pad = C, C_pad
    w_stack = jnp.stack(w_list).astype(jnp.bfloat16)           # (H, D_pad, C_pad)
    b_stack = jnp.stack(b_list).astype(jnp.float32)            # (H, 1, C_pad)

    # --- Batch tiling: large tiles for the HBM roofline, >= 2 grid steps when
    #     the batch allows it (v7x megacore), shrunk if VMEM does not fit. ---
    vmem_cap = _vmem_capacity_bytes()
    budget = min(int(vmem_cap * 0.8), vmem_cap - 8 * 1024 * 1024)

    w_bytes = H * D_pad * C_pad * 2 + H * C_pad * 4            # single-buffered

    def tiles_bytes(tb):                                       # double-buffered
        return 2 * tb * D_pad * 4 + 2 * H * tb * C_pad * 4

    TILE_B = min(512, _round_up(max(-(-B // 2), 1), 8), _round_up(B, 8))
    while TILE_B > 8 and w_bytes + tiles_bytes(TILE_B) + 4 * 1024 * 1024 > budget:
        TILE_B = max(8, _round_up(TILE_B // 2, 8))
    # TODO(synk): for very large H*D*C (weights alone exceeding the VMEM budget
    # on v7x) switch to streaming one head per innermost 'arbitrary' grid axis
    # with the chained activation carried in a (TILE_B, D_pad) VMEM scratch.

    B_pad = _round_up(B, TILE_B)
    if (B_pad, D_pad) != x_flat.shape:
        x_flat = jnp.pad(x_flat, ((0, B_pad - B), (0, D_pad - D)))
    grid = (B_pad // TILE_B,)

    need = w_bytes + tiles_bytes(TILE_B)
    headroom = 8 * 1024 * 1024 + 6 * TILE_B * max(D_pad, C_pad) * 4
    vmem_limit = int(min(need + headroom, vmem_cap - 4 * 1024 * 1024))

    const3 = lambda b: (0, 0, 0)
    out = pl.pallas_call(
        _make_kernel(H, D, C, C_pad),
        out_shape=tuple(jax.ShapeDtypeStruct((B_pad, C_pad), jnp.float32)
                        for _ in range(H)),
        grid_spec=pltpu.PrefetchScalarGridSpec(
            num_scalar_prefetch=0,
            grid=grid,
            in_specs=[
                pl.BlockSpec((TILE_B, D_pad), lambda b: (b, 0)),
                # Constant block index -> weights/bias stay VMEM-resident with a
                # single buffer (no pointless double-buffering of static data).
                pl.BlockSpec((H, D_pad, C_pad), const3,
                             pipeline_mode=pl.Buffered(1)),
                pl.BlockSpec((H, 1, C_pad), const3,
                             pipeline_mode=pl.Buffered(1)),
            ],
            out_specs=[pl.BlockSpec((TILE_B, C_pad), lambda b: (b, 0))
                       for _ in range(H)],
        ),
        compiler_params=pltpu.CompilerParams(
            dimension_semantics=("parallel",),
            vmem_limit_bytes=vmem_limit,
        ),
    )(x_flat, w_stack, b_stack)

    return [o[:B, :C] for o in out]


def multi_prototypes_reference(x, params):
    """Pure-JAX f32 reference of the PyTorch forward (for validation)."""
    B = x.shape[0]
    cur = x.reshape(B, -1).astype(jnp.float32)
    outs = []
    for p in params:
        mean = jnp.mean(cur, axis=-1, keepdims=True)
        var = jnp.mean((cur - mean) ** 2, axis=-1, keepdims=True)
        xn = (cur - mean) / jnp.sqrt(var + _LN_EPS)
        xn = xn * p["gamma"] + p["beta"]
        y = xn @ p["w_t"] + p["bias"]
        y = _SELU_SCALE * jnp.where(y > 0, y, _SELU_ALPHA * (jnp.exp(y) - 1.0))
        prob = jax.nn.softmax(y, axis=-1)
        outs.append(prob)
        cur = prob
    return outs


if __name__ == "__main__":
    def run_case(case_key, B, Cch, Hs, Ws, nmb_heads):
        output_dim = Cch * Hs * Ws
        n_classes = output_dim          # chained heads require equality
        kx, kp = jax.random.split(case_key)
        x = jax.random.normal(kx, (B, Cch, Hs, Ws), dtype=jnp.float32)
        params = init_multi_prototypes_params(kp, output_dim, n_classes, nmb_heads)

        outs = [jax.block_until_ready(o)
                for o in multi_prototypes_forward(x, params)]
        refs = multi_prototypes_reference(x, params)

        for o, r in zip(outs, refs):
            assert o.shape == (B, n_classes)
            assert bool(jnp.all(jnp.isfinite(o)))
            # Softmax rows sum to ~1 (bf16 MXU inputs -> loosened tolerance).
            assert bool(jnp.all(jnp.abs(jnp.sum(o, axis=1) - 1.0) < 1e-2))
            assert bool(jnp.max(jnp.abs(o - r)) < 1e-2)

    key = jax.random.PRNGKey(0)
    k1, k2 = jax.random.split(key)
    # Lane-dense case: D = C = 128 (no padding path).
    run_case(k1, B=2, Cch=8, Hs=4, Ws=4, nmb_heads=2)
    # Padded case: D = C = 96 -> padded to 128 (exercises LN / softmax masking).
    run_case(k2, B=4, Cch=6, Hs=4, Ws=4, nmb_heads=2)

    print("KERNEL_OK")
</pallas_src>

<mosaic_0001>
module attributes {stable_mosaic.version = 11 : i64} {
  func.func @kernel(%arg0: i32, %arg1: memref<8x128xf32, #tpu.memory_space<vmem>>, %arg2: memref<2x128x128xbf16, #tpu.memory_space<vmem>>, %arg3: memref<2x1x128xf32, #tpu.memory_space<vmem>>, %arg4: memref<8x128xf32, #tpu.memory_space<vmem>>, %arg5: memref<8x128xf32, #tpu.memory_space<vmem>>) attributes {dimension_semantics = [#tpu.dimension_semantics<parallel>], iteration_bounds = array<i64: 1>, scalar_prefetch = 0 : i64, scratch_operands = 0 : i64, tpu.core_type = #tpu.core_type<tc>, window_params = [{transform_indices = @transform_0, window_bounds = array<i64: 8, 128>}, {pipeline_mode = #tpu.pipeline_mode<synchronous>, transform_indices = @transform_1, window_bounds = array<i64: 2, 128, 128>}, {pipeline_mode = #tpu.pipeline_mode<synchronous>, transform_indices = @transform_2, window_bounds = array<i64: 2, 1, 128>}, {transform_indices = @transform_3, window_bounds = array<i64: 8, 128>}, {transform_indices = @transform_4, window_bounds = array<i64: 8, 128>}]} {
    %c0 = arith.constant 0 : index
    %c0_0 = arith.constant 0 : index
    %0 = vector.load %arg1[%c0, %c0_0] : memref<8x128xf32, #tpu.memory_space<vmem>>, vector<8x128xf32>
    %cst = arith.constant dense<0.000000e+00> : vector<8xf32>
    %1 = vector.multi_reduction <add>, %0, %cst [1] : vector<8x128xf32> to vector<8xf32>
    %2 = vector.shape_cast %1 : vector<8xf32> to vector<8x1xf32>
    %3 = arith.mulf %0, %0 : vector<8x128xf32>
    %cst_1 = arith.constant dense<0.000000e+00> : vector<8xf32>
    %4 = vector.multi_reduction <add>, %3, %cst_1 [1] : vector<8x128xf32> to vector<8xf32>
    %5 = vector.shape_cast %4 : vector<8xf32> to vector<8x1xf32>
    %cst_2 = arith.constant 7.812500e-03 : f32
    %6 = vector.broadcast %cst_2 : f32 to vector<8x1xf32>
    %7 = arith.mulf %2, %6 : vector<8x1xf32>
    %cst_3 = arith.constant 7.812500e-03 : f32
    %8 = vector.broadcast %cst_3 : f32 to vector<8x1xf32>
    %9 = arith.mulf %5, %8 : vector<8x1xf32>
    %10 = arith.mulf %7, %7 : vector<8x1xf32>
    %11 = arith.subf %9, %10 : vector<8x1xf32>
    %cst_4 = arith.constant 0.000000e+00 : f32
    %12 = vector.broadcast %cst_4 : f32 to vector<8x1xf32>
    %13 = arith.maximumf %11, %12 : vector<8x1xf32>
    %14 = vector.broadcast %7 : vector<8x1xf32> to vector<8x128xf32>
    %15 = arith.subf %0, %14 : vector<8x128xf32>
    %cst_5 = arith.constant 9.99999974E-6 : f32
    %16 = vector.broadcast %cst_5 : f32 to vector<8x1xf32>
    %17 = arith.addf %13, %16 : vector<8x1xf32>
    %18 = math.rsqrt %17 : vector<8x1xf32>
    %19 = vector.broadcast %18 : vector<8x1xf32> to vector<8x128xf32>
    %20 = arith.mulf %15, %19 : vector<8x128xf32>
    %21 = arith.truncf %20 : vector<8x128xf32> to vector<8x128xbf16>
    %c0_6 = arith.constant 0 : index
    %c0_7 = arith.constant 0 : index
    %c0_8 = arith.constant 0 : index
    %22 = vector.load %arg2[%c0_6, %c0_7, %c0_8] : memref<2x128x128xbf16, #tpu.memory_space<vmem>>, vector<1x128x128xbf16>
    %23 = vector.shape_cast %22 : vector<1x128x128xbf16> to vector<128x128xbf16>
    %cst_9 = arith.constant dense<0.000000e+00> : vector<8x128xf32>
    %24 = tpu.matmul %21, %23, %cst_9 {dimension_numbers = #tpu.dot_dimension_numbers<[1], [0], [0], [1], [0, 0, 1, 1], [], []>} : vector<8x128xbf16>, vector<128x128xbf16>, vector<8x128xf32> -> vector<8x128xf32>
    %c0_10 = arith.constant 0 : index
    %c0_11 = arith.constant 0 : index
    %c0_12 = arith.constant 0 : index
    %25 = vector.load %arg3[%c0_10, %c0_11, %c0_12] : memref<2x1x128xf32, #tpu.memory_space<vmem>>, vector<1x1x128xf32>
    %26 = vector.shape_cast %25 : vector<1x1x128xf32> to vector<1x128xf32>
    %27 = vector.broadcast %26 : vector<1x128xf32> to vector<8x128xf32>
    %28 = arith.addf %24, %27 : vector<8x128xf32>
    %cst_13 = arith.constant 0.000000e+00 : f32
    %29 = vector.broadcast %cst_13 : f32 to vector<8x128xf32>
    %30 = arith.cmpf ogt, %28, %29 : vector<8x128xf32>
    %cst_14 = arith.constant 0.000000e+00 : f32
    %31 = vector.broadcast %cst_14 : f32 to vector<8x128xf32>
    %32 = arith.minimumf %28, %31 : vector<8x128xf32>
    %33 = math.exp %32 : vector<8x128xf32>
    %cst_15 = arith.constant 1.000000e+00 : f32
    %34 = vector.broadcast %cst_15 : f32 to vector<8x128xf32>
    %35 = arith.subf %33, %34 : vector<8x128xf32>
    %cst_16 = arith.constant 1.67326319 : f32
    %36 = vector.broadcast %cst_16 : f32 to vector<8x128xf32>
    %37 = arith.mulf %36, %35 : vector<8x128xf32>
    %38 = arith.select %30, %28, %37 : vector<8x128xi1>, vector<8x128xf32>
    %cst_17 = arith.constant 1.05070102 : f32
    %39 = vector.broadcast %cst_17 : f32 to vector<8x128xf32>
    %40 = arith.mulf %39, %38 : vector<8x128xf32>
    %cst_18 = arith.constant dense<0xFF800000> : vector<8xf32>
    %41 = vector.multi_reduction <maximumf>, %40, %cst_18 [1] : vector<8x128xf32> to vector<8xf32>
    %42 = vector.shape_cast %41 : vector<8xf32> to vector<8x1xf32>
    %43 = vector.broadcast %42 : vector<8x1xf32> to vector<8x128xf32>
    %44 = arith.subf %40, %43 : vector<8x128xf32>
    %45 = math.exp %44 : vector<8x128xf32>
    %cst_19 = arith.constant dense<0.000000e+00> : vector<8xf32>
    %46 = vector.multi_reduction <add>, %45, %cst_19 [1] : vector<8x128xf32> to vector<8xf32>
    %47 = vector.shape_cast %46 : vector<8xf32> to vector<8x1xf32>
    %48 = tpu.reciprocal %47 : vector<8x1xf32> -> vector<8x1xf32>
    %49 = vector.broadcast %48 : vector<8x1xf32> to vector<8x128xf32>
    %50 = arith.mulf %45, %49 : vector<8x128xf32>
    %c0_20 = arith.constant 0 : index
    %c0_21 = arith.constant 0 : index
    %51 = vector.load %arg4[%c0_20, %c0_21] : memref<8x128xf32, #tpu.memory_space<vmem>>, vector<8x128xf32>
    tpu.vector_store %arg4[%c0_20, %c0_21], %50 {strides = array<i32>} : memref<8x128xf32, #tpu.memory_space<vmem>>, vector<8x128xf32>,
    %cst_22 = arith.constant dense<0.000000e+00> : vector<8xf32>
    %52 = vector.multi_reduction <add>, %50, %cst_22 [1] : vector<8x128xf32> to vector<8xf32>
    %53 = vector.shape_cast %52 : vector<8xf32> to vector<8x1xf32>
    %54 = arith.mulf %50, %50 : vector<8x128xf32>
    %cst_23 = arith.constant dense<0.000000e+00> : vector<8xf32>
    %55 = vector.multi_reduction <add>, %54, %cst_23 [1] : vector<8x128xf32> to vector<8xf32>
    %56 = vector.shape_cast %55 : vector<8xf32> to vector<8x1xf32>
    %cst_24 = arith.constant 7.812500e-03 : f32
    %57 = vector.broadcast %cst_24 : f32 to vector<8x1xf32>
    %58 = arith.mulf %53, %57 : vector<8x1xf32>
    %cst_25 = arith.constant 7.812500e-03 : f32
    %59 = vector.broadcast %cst_25 : f32 to vector<8x1xf32>
    %60 = arith.mulf %56, %59 : vector<8x1xf32>
    %61 = arith.mulf %58, %58 : vector<8x1xf32>
    %62 = arith.subf %60, %61 : vector<8x1xf32>
    %cst_26 = arith.constant 0.000000e+00 : f32
    %63 = vector.broadcast %cst_26 : f32 to vector<8x1xf32>
    %64 = arith.maximumf %62, %63 : vector<8x1xf32>
    %65 = vector.broadcast %58 : vector<8x1xf32> to vector<8x128xf32>
    %66 = arith.subf %50, %65 : vector<8x128xf32>
    %cst_27 = arith.constant 9.99999974E-6 : f32
    %67 = vector.broadcast %cst_27 : f32 to vector<8x1xf32>
    %68 = arith.addf %64, %67 : vector<8x1xf32>
    %69 = math.rsqrt %68 : vector<8x1xf32>
    %70 = vector.broadcast %69 : vector<8x1xf32> to vector<8x128xf32>
    %71 = arith.mulf %66, %70 : vector<8x128xf32>
    %72 = arith.truncf %71 : vector<8x128xf32> to vector<8x128xbf16>
    %c1 = arith.constant 1 : index
    %c0_28 = arith.constant 0 : index
    %c0_29 = arith.constant 0 : index
    %73 = vector.load %arg2[%c1, %c0_28, %c0_29] : memref<2x128x128xbf16, #tpu.memory_space<vmem>>, vector<1x128x128xbf16>
    %74 = vector.shape_cast %73 : vector<1x128x128xbf16> to vector<128x128xbf16>
    %cst_30 = arith.constant dense<0.000000e+00> : vector<8x128xf32>
    %75 = tpu.matmul %72, %74, %cst_30 {dimension_numbers = #tpu.dot_dimension_numbers<[1], [0], [0], [1], [0, 0, 1, 1], [], []>} : vector<8x128xbf16>, vector<128x128xbf16>, vector<8x128xf32> -> vector<8x128xf32>
    %c1_31 = arith.constant 1 : index
    %c0_32 = arith.constant 0 : index
    %c0_33 = arith.constant 0 : index
    %76 = vector.load %arg3[%c1_31, %c0_32, %c0_33] : memref<2x1x128xf32, #tpu.memory_space<vmem>>, vector<1x1x128xf32>
    %77 = vector.shape_cast %76 : vector<1x1x128xf32> to vector<1x128xf32>
    %78 = vector.broadcast %77 : vector<1x128xf32> to vector<8x128xf32>
    %79 = arith.addf %75, %78 : vector<8x128xf32>
    %cst_34 = arith.constant 0.000000e+00 : f32
    %80 = vector.broadcast %cst_34 : f32 to vector<8x128xf32>
    %81 = arith.cmpf ogt, %79, %80 : vector<8x128xf32>
    %cst_35 = arith.constant 0.000000e+00 : f32
    %82 = vector.broadcast %cst_35 : f32 to vector<8x128xf32>
    %83 = arith.minimumf %79, %82 : vector<8x128xf32>
    %84 = math.exp %83 : vector<8x128xf32>
    %cst_36 = arith.constant 1.000000e+00 : f32
    %85 = vector.broadcast %cst_36 : f32 to vector<8x128xf32>
    %86 = arith.subf %84, %85 : vector<8x128xf32>
    %cst_37 = arith.constant 1.67326319 : f32
    %87 = vector.broadcast %cst_37 : f32 to vector<8x128xf32>
    %88 = arith.mulf %87, %86 : vector<8x128xf32>
    %89 = arith.select %81, %79, %88 : vector<8x128xi1>, vector<8x128xf32>
    %cst_38 = arith.constant 1.05070102 : f32
    %90 = vector.broadcast %cst_38 : f32 to vector<8x128xf32>
    %91 = arith.mulf %90, %89 : vector<8x128xf32>
    %cst_39 = arith.constant dense<0xFF800000> : vector<8xf32>
    %92 = vector.multi_reduction <maximumf>, %91, %cst_39 [1] : vector<8x128xf32> to vector<8xf32>
    %93 = vector.shape_cast %92 : vector<8xf32> to vector<8x1xf32>
    %94 = vector.broadcast %93 : vector<8x1xf32> to vector<8x128xf32>
    %95 = arith.subf %91, %94 : vector<8x128xf32>
    %96 = math.exp %95 : vector<8x128xf32>
    %cst_40 = arith.constant dense<0.000000e+00> : vector<8xf32>
    %97 = vector.multi_reduction <add>, %96, %cst_40 [1] : vector<8x128xf32> to vector<8xf32>
    %98 = vector.shape_cast %97 : vector<8xf32> to vector<8x1xf32>
    %99 = tpu.reciprocal %98 : vector<8x1xf32> -> vector<8x1xf32>
    %100 = vector.broadcast %99 : vector<8x1xf32> to vector<8x128xf32>
    %101 = arith.mulf %96, %100 : vector<8x128xf32>
    %c0_41 = arith.constant 0 : index
    %c0_42 = arith.constant 0 : index
    %102 = vector.load %arg5[%c0_41, %c0_42] : memref<8x128xf32, #tpu.memory_space<vmem>>, vector<8x128xf32>
    tpu.vector_store %arg5[%c0_41, %c0_42], %101 {strides = array<i32>} : memref<8x128xf32, #tpu.memory_space<vmem>>, vector<8x128xf32>,
    return
  }
  func.func @transform_0(%arg0: i32) -> (i32, i32) {
    %c0_i32 = arith.constant 0 : i32
    %c0_i32_0 = arith.constant 0 : i32
    return %arg0, %c0_i32 : i32, i32
  }
  func.func @transform_1(%arg0: i32) -> (i32, i32, i32) {
    %c0_i32 = arith.constant 0 : i32
    %c0_i32_0 = arith.constant 0 : i32
    %c0_i32_1 = arith.constant 0 : i32
    %c0_i32_2 = arith.constant 0 : i32
    return %c0_i32, %c0_i32_0, %c0_i32_1 : i32, i32, i32
  }
  func.func @transform_2(%arg0: i32) -> (i32, i32, i32) {
    %c0_i32 = arith.constant 0 : i32
    %c0_i32_0 = arith.constant 0 : i32
    %c0_i32_1 = arith.constant 0 : i32
    %c0_i32_2 = arith.constant 0 : i32
    return %c0_i32, %c0_i32_0, %c0_i32_1 : i32, i32, i32
  }
  func.func @transform_3(%arg0: i32) -> (i32, i32) {
    %c0_i32 = arith.constant 0 : i32
    %c0_i32_0 = arith.constant 0 : i32
    return %arg0, %c0_i32 : i32, i32
  }
  func.func @transform_4(%arg0: i32) -> (i32, i32) {
    %c0_i32 = arith.constant 0 : i32
    %c0_i32_0 = arith.constant 0 : i32
    return %arg0, %c0_i32 : i32, i32
  }
}

</mosaic_0001>

<bundles_post_ra>
// kernel: tpu_custom_call.1
= control target key start
LH: loop header
LB: loop body
LE: loop exit
PB: predicated region body
PF: predicated region fallthrough
CT: control target
= control target key end

     0   :  { %10 = vsyncpa [#allocation3], 0  ;;  %s693_s0 = inlined_call_operand.hbm [shape: f32[8,128], index: 0, kind: input, shape index: {}]   ;;  %s694_s1 = inlined_call_operand.hbm [shape: bf16[2,128,128], index: 1, kind: input, shape index: {}]   ;;  %s695_s2 = inlined_call_operand.vmem [shape: f32[2,1,128], index: 2, kind: input, shape index: {}]   ;;  %s696_s3 = inlined_call_operand.hbm [shape: f32[8,128], index: 3, kind: output, shape index: {0}]   ;;  %s697_s4 = inlined_call_operand.hbm [shape: f32[8,128], index: 4, kind: output, shape index: {1}]  }
   0x1   :  { %11 = vsyncpa [#allocation6], 0 }
   0x2   :  { %12 = vsyncpa [#allocation4], 0 }
   0x3   :  { %13 = vsyncpa [#allocation9], 0  ;;  %s581_s15 = smov [#allocation2]   ;;  %s582_s17 = smov [#allocation5]  }
   0x4   :  { %s20_s16 = sshll.u32 %s581_s15, 4  ;;  %s29_s18 = sshll.u32 %s582_s17, 4  ;;  %s21_s16 = int_to_ptr.vmem [resolvable:$true] %s20_s16  ;;  %s614_s18 = int_to_ptr.vmem [resolvable:$true] %s29_s18 }
   0x5   :  { %s485_s21 = scalar_lea.hbm %s693_s0, 128 }
   0x6   :  { %p486_p0 = scmp.ne.s32.totalorder %s693_s0, %s485_s21  ;;  %p489_p1 = scmp.lt.u32.totalorder %s485_s21, %s693_s0 }
   0x8   :  { %p491_p2 = pnand %p489_p1, %p486_p0 }
   0xa   :  { %494 = shalt.err (!%p491_p2)
}
   0xb   :  { %s495_s26 = scalar_lea.vmem %s21_s16, 128  ;;  %p500_p4 = scmp.lt.s32.totalorder %s21_s16, %s21_s16 }
   0xc   :  { %p496_p3 = scmp.ne.s32.totalorder %s21_s16, %s495_s26  ;;  %p501_p5 = scmp.lt.s32.totalorder %s495_s26, %s495_s26 }
   0xe   :  { %p502_p6 = por %p501_p5, %p500_p4 }
  0x10   :  { %p503_p7 = pnand %p502_p6, %p496_p3 }
  0x12   :  { %506 = shalt.err (!%p503_p7)
}
  0x13   :  { %23 = dma.hbm_to_vmem [thread:$0]  %s693_s0, 128, %s21_s16, [#allocation3]  }
  0x14   :  { %s507_s5 = scalar_lea.hbm %s694_s1, 2048 }
  0x15   :  { %p508_p8 = scmp.ne.s32.totalorder %s694_s1, %s507_s5  ;;  %p511_p9 = scmp.lt.u32.totalorder %s507_s5, %s694_s1 }
  0x17   :  { %p513_p10 = pnand %p511_p9, %p508_p8 }
  0x19   :  { %516 = shalt.err (!%p513_p10)
}
  0x1a   :  { %s517_s10 = scalar_lea.vmem %s614_s18, 2048  ;;  %p522_p12 = scmp.lt.s32.totalorder %s614_s18, %s614_s18 }
  0x1b   :  { %p518_p11 = scmp.ne.s32.totalorder %s614_s18, %s517_s10  ;;  %p523_p13 = scmp.lt.s32.totalorder %s517_s10, %s517_s10 }
  0x1d   :  { %p524_p0 = por %p523_p13, %p522_p12 }
  0x1f   :  { %p525_p1 = pnand %p524_p0, %p518_p11 }
  0x21   :  { %528 = shalt.err (!%p525_p1)
}
  0x22   :  { %s583_s0 = smov 64   ;;  %s584_s11 = smov 4  }
  0x23   :  { %35 = dma.hbm_to_vmem [thread:$0]  %s694_s1, 2048, %s614_s18, [#allocation6], %s583_s0, %s583_s0, %s584_s11  }
  0x24   :  { %573 = dma.done.wait [#allocation3], 128  }
  0x25   :  { %574 = vsyncadd [#allocation3], 4294967168 }
  0x26   :  { %575 = dma.done.wait [#allocation6], 2048  }
  0x27   :  { %576 = vsyncadd [#allocation6], 4294965248  ;;  %v585_v0 = vmov 0.0   ;;  %v45_v1 = vld [vmem:[#allocation2] sm:$0xff]  ;;  %v453_v3 = vld [vmem:[#allocation5] sm:$0xff]   ;;  %vm586_vm0 = vmmov 0  }
  0x28   :  { %405 = vmatprep.subr.bf16.mxu0 %v585_v0  ;;  %425 = vmatprep.subr.bf16.mxu1 %v585_v0  ;;  %v48_v2 = vmul.f32 %v45_v1, %v45_v1  ;;  %v454_v4 = vld [vmem:[#allocation5 + $0x8] sm:$0xff]   ;;  %v455_v5 = vld [vmem:[#allocation5 + $0x10] sm:$0xff]   ;;  %v456_v6 = vld [vmem:[#allocation5 + $0x18] sm:$0xff]  }
  0x29   :  { %46 = vadd.xlane.f32.xlu0 %v45_v1  ;;  %406 = vmatpush3.bf16.msra.mxu0 %v453_v3  ;;  %v457_v7 = vld [vmem:[#allocation5 + $0x20] sm:$0xff]   ;;  %v458_v8 = vld [vmem:[#allocation5 + $0x28] sm:$0xff]   ;;  %v459_v9 = vld [vmem:[#allocation5 + $0x30] sm:$0xff]  }
  0x2a   :  { %407 = vmatprep.subr.bf16.mxu0 %v585_v0  ;;  %421 = vmatprep.mubr.msk.bf16.mxu0 %vm586_vm0, %v585_v0  ;;  %v460_v10 = vld [vmem:[#allocation5 + $0x38] sm:$0xff]   ;;  %v461_v40 = vld [vmem:[#allocation5 + $0x40] sm:$0xff]   ;;  %v462_v41 = vld [vmem:[#allocation5 + $0x48] sm:$0xff]  }
  0x2b   :  { %441 = vmatprep.mubr.msk.bf16.mxu1 %vm586_vm0, %v585_v0  ;;  %v366_v23 = vld [vmem:[%s695_s2] ss:$0 sm:$0xff]  ;;  %426 = vmatpush3.bf16.msra.mxu1 %v461_v40  ;;  %v463_v46 = vld [vmem:[#allocation5 + $0x50] sm:$0xff]   ;;  %v465_v48 = vld [vmem:[#allocation5 + $0x60] sm:$0xff]  }
  0x2c   :  { %427 = vmatprep.subr.bf16.mxu1 %v585_v0  ;;  %v464_v47 = vld [vmem:[#allocation5 + $0x58] sm:$0xff]   ;;  %v466_v49 = vld [vmem:[#allocation5 + $0x68] sm:$0xff]   ;;  %v467_v50 = vld [vmem:[#allocation5 + $0x70] sm:$0xff]  }
  0x2d   :  { %49 = vadd.xlane.f32.xlu0 %v48_v2  ;;  %408 = vmatpush3.bf16.msra.mxu0 %v454_v4  ;;  %v468_v51 = vld [vmem:[#allocation5 + $0x78] sm:$0xff]  }
  0x2e   :  { %409 = vmatprep.subr.bf16.mxu0 %v585_v0 }
  0x2f   :  { %428 = vmatpush3.bf16.msra.mxu1 %v462_v41 }
  0x30   :  { %429 = vmatprep.subr.bf16.mxu1 %v585_v0 }
  0x31   :  { %410 = vmatpush3.bf16.msra.mxu0 %v455_v5 }
  0x32   :  { %411 = vmatprep.subr.bf16.mxu0 %v585_v0 }
  0x33   :  { %430 = vmatpush3.bf16.msra.mxu1 %v463_v46 }
  0x34   :  { %431 = vmatprep.subr.bf16.mxu1 %v585_v0 }
  0x35   :  { %412 = vmatpush3.bf16.msra.mxu0 %v456_v6 }
  0x36   :  { %413 = vmatprep.subr.bf16.mxu0 %v585_v0 }
  0x37   :  { %432 = vmatpush3.bf16.msra.mxu1 %v464_v47 }
  0x38   :  { %433 = vmatprep.subr.bf16.mxu1 %v585_v0 }
  0x39   :  { %414 = vmatpush3.bf16.msra.mxu0 %v457_v7 }
  0x3a   :  { %415 = vmatprep.subr.bf16.mxu0 %v585_v0 }
  0x3b   :  { %434 = vmatpush3.bf16.msra.mxu1 %v465_v48 }
  0x3c   :  { %435 = vmatprep.subr.bf16.mxu1 %v585_v0 }
  0x3d   :  { %416 = vmatpush3.bf16.msra.mxu0 %v458_v8 }
  0x3e   :  { %417 = vmatprep.subr.bf16.mxu0 %v585_v0 }
  0x3f   :  { %436 = vmatpush3.bf16.msra.mxu1 %v466_v49 }
  0x40   :  { %437 = vmatprep.subr.bf16.mxu1 %v585_v0 }
  0x41   :  { %418 = vmatpush3.bf16.msra.mxu0 %v459_v9 }
  0x42   :  { %419 = vmatprep.subr.bf16.mxu0 %v585_v0 }
  0x43   :  { %438 = vmatpush3.bf16.msra.mxu1 %v467_v50 }
  0x44   :  { %439 = vmatprep.subr.bf16.mxu1 %v585_v0 }
  0x45   :  { %420 = vmatpush3.bf16.msra.mxu0 %v460_v10 }
  0x47   :  { %440 = vmatpush3.bf16.msra.mxu1 %v468_v51 }
  0xb6   :  { %v47_v11 = vpop.xlane.xlu0 %46 }
  0xb7   :  { %v51_v12 = vmul.f32 0.0078125, %v47_v11 }
  0xb9   :  { %v53_v14 = vmul.f32 %v51_v12, %v51_v12  ;;  %v56_v19 = vsub.f32 %v45_v1, %v51_v12  ;;  %v377_v1 = vld [vmem:[%s695_s2 + $0x1] ss:$0 sm:$0xff]  ;;  %s587_s2 = smov [#allocation7]  }
  0xba   :  { %v50_v13 = vpop.xlane.xlu0 %49  ;;  %s342_s17 = sshll.u32 %s587_s2, 4  ;;  %s343_s17 = int_to_ptr.vmem [resolvable:$true] %s342_s17 }
  0xbb   :  { %v52_v15 = vmul.f32 0.0078125, %v50_v13  ;;  %s529_s18 = scalar_lea.vmem %s343_s17, 128  ;;  %p534_p3 = scmp.lt.s32.totalorder %s343_s17, %s343_s17 }
  0xbc   :  { %p530_p2 = scmp.ne.s32.totalorder %s343_s17, %s529_s18  ;;  %p535_p4 = scmp.lt.s32.totalorder %s529_s18, %s529_s18 }
  0xbd   :  { %v54_v16 = vsub.f32 %v52_v15, %v53_v14 }
  0xbe   :  { %p536_p5 = por %p535_p4, %p534_p3 }
  0xbf   :  { %v55_v17 = vmax.f32 %v54_v16, 0.0 }
  0xc0   :  { %p537_p6 = pnand %p536_p5, %p530_p2 }
  0xc1   :  { %v57_v18 = vadd.f32 1e-05, %v55_v17 }
  0xc3   :  { %469 = vrsqrt.f32 %v57_v18 }
  0xcd   :  { %v470_v20 = vpop.eup %469 }
  0xce   :  { %v59_v21 = vmul.f32 %v470_v20, %v56_v19 }
  0xd0   :  { %v60_v22 = vpack.c.bf16 %v59_v21, %v59_v21 }
  0xd2   :  { %422 = vmatmul.mubr.bf16.vlgmr.msra.gmra.mrb[0].mxu0 %v60_v22 }
 0x1a5   :  { %v166_v24 = vpop.f32.mrb[0].mxu0 }
 0x1a6   :  { %v167_v25 = vadd.f32 %v366_v23, %v166_v24  ;;  %v423_v26 = vpop.f32.mrb[1].mxu0 }
 0x1a7   :  { %v169_v27 = vpop.f32.mrb[2].mxu0 }
 0x1a8   :  { %v173_v28 = vmin.f32 %v167_v25, 0.0  ;;  %v424_v29 = vpop.f32.mrb[3].mxu0  ;;  %vm172_vm1 = vcmp.gt.f32.partialorder %v167_v25, 0.0 }
 0x1aa   :  { %v174_v30 = vmul.f32 1.442695, %v173_v28 }
 0x1ac   :  { %471 = vpow2.f32 %v174_v30 }
 0x1b6   :  { %v472_v31 = vpop.eup %471 }
 0x1b7   :  { %v375_v32 = vadd.f32 -1.0, %v472_v31 }
 0x1b9   :  { %v177_v33 = vmul.f32 1.6732632, %v375_v32 }
 0x1bb   :  { %v178_v34 = vsel %vm172_vm1, %v167_v25, %v177_v33 }
 0x1bc   :  { %v179_v35 = vmul.f32 1.050701, %v178_v34 }
 0x1be   :  { %180 = vmax.xlane.f32.xlu1 %v179_v35 }
 0x24b   :  { %v181_v36 = vpop.xlane.xlu1 %180 }
 0x24c   :  { %v182_v37 = vsub.f32 %v179_v35, %v181_v36 }
 0x24e   :  { %v183_v38 = vmul.f32 1.442695, %v182_v37 }
 0x250   :  { %473 = vpow2.f32 %v183_v38 }
 0x25a   :  { %v474_v39 = vpop.eup %473 }
 0x25b   :  { %185 = vadd.xlane.f32.xlu1 %v474_v39 }
 0x2e8   :  { %v186_v42 = vpop.xlane.xlu1 %185 }
 0x2e9   :  { %475 = vrcp.f32 %v186_v42 }
 0x2f3   :  { %v476_v43 = vpop.eup %475 }
 0x2f4   :  { %v188_v44 = vmul.f32 %v476_v43, %v474_v39 }
 0x2f6   :  { %190 = vadd.xlane.f32.xlu0 %v188_v44  ;;  %189 = vst [vmem:[#allocation7] sm:$0xff] %v188_v44  ;;  %v192_v45 = vmul.f32 %v188_v44, %v188_v44 }
 0x2f8   :  { %193 = vadd.xlane.f32.xlu1 %v192_v45 }
 0x383   :  { %v191_v52 = vpop.xlane.xlu0 %190 }
 0x384   :  { %v195_v53 = vmul.f32 0.0078125, %v191_v52 }
 0x385   :  { %v194_v54 = vpop.xlane.xlu1 %193 }
 0x386   :  { %v197_v55 = vmul.f32 %v195_v53, %v195_v53  ;;  %v196_v56 = vmul.f32 0.0078125, %v194_v54  ;;  %v200_v60 = vsub.f32 %v188_v44, %v195_v53 }
 0x388   :  { %v198_v57 = vsub.f32 %v196_v56, %v197_v55 }
 0x38a   :  { %v199_v58 = vmax.f32 %v198_v57, 0.0 }
 0x38c   :  { %v201_v59 = vadd.f32 1e-05, %v199_v58 }
 0x38e   :  { %477 = vrsqrt.f32 %v201_v59 }
 0x398   :  { %v478_v61 = vpop.eup %477 }
 0x399   :  { %v203_v62 = vmul.f32 %v478_v61, %v200_v60 }
 0x39b   :  { %v204_v63 = vpack.c.bf16 %v203_v62, %v203_v62 }
 0x39d   :  { %442 = vmatmul.mubr.bf16.vlgmr.msra.gmra.mrb[0].mxu1 %v204_v63 }
 0x470   :  { %v312_v0 = vpop.f32.mrb[0].mxu1 }
 0x471   :  { %v313_v2 = vadd.f32 %v377_v1, %v312_v0  ;;  %v443_v3 = vpop.f32.mrb[1].mxu1 }
 0x472   :  { %v315_v4 = vpop.f32.mrb[2].mxu1 }
 0x473   :  { %v319_v5 = vmin.f32 %v313_v2, 0.0  ;;  %v444_v6 = vpop.f32.mrb[3].mxu1  ;;  %vm318_vm2 = vcmp.gt.f32.partialorder %v313_v2, 0.0 }
 0x475   :  { %v320_v7 = vmul.f32 1.442695, %v319_v5 }
 0x477   :  { %479 = vpow2.f32 %v320_v7 }
 0x481   :  { %v480_v8 = vpop.eup %479 }
 0x482   :  { %v386_v9 = vadd.f32 -1.0, %v480_v8 }
 0x484   :  { %v323_v10 = vmul.f32 1.6732632, %v386_v9 }
 0x486   :  { %v324_v11 = vsel %vm318_vm2, %v313_v2, %v323_v10 }
 0x487   :  { %v325_v12 = vmul.f32 1.050701, %v324_v11 }
 0x489   :  { %326 = vmax.xlane.f32.xlu0 %v325_v12 }
 0x516   :  { %v327_v13 = vpop.xlane.xlu0 %326 }
 0x517   :  { %v328_v14 = vsub.f32 %v325_v12, %v327_v13 }
 0x519   :  { %v329_v15 = vmul.f32 1.442695, %v328_v14 }
 0x51b   :  { %481 = vpow2.f32 %v329_v15 }
 0x525   :  { %v482_v16 = vpop.eup %481 }
 0x526   :  { %331 = vadd.xlane.f32.xlu1 %v482_v16 }
 0x527   :  { %540 = shalt.err (!%p537_p6)
}
 0x528   :  { %s541_s21 = scalar_lea.hbm %s696_s3, 128 }
 0x529   :  { %p542_p7 = scmp.ne.s32.totalorder %s696_s3, %s541_s21  ;;  %p545_p8 = scmp.lt.u32.totalorder %s541_s21, %s696_s3 }
 0x52b   :  { %p547_p9 = pnand %p545_p8, %p542_p7 }
 0x52d   :  { %550 = shalt.err (!%p547_p9)
}
 0x52e   :  { %345 = dma.vmem_to_hbm [thread:$0]  %s343_s17, 128, %s696_s3, [#allocation4]  }
 0x52f   :  { %s588_s28 = smov [#allocation8]  }
 0x530   :  { %s352_s29 = sshll.u32 %s588_s28, 4  ;;  %s353_s29 = int_to_ptr.vmem [resolvable:$true] %s352_s29 }
 0x531   :  { %s551_s30 = scalar_lea.vmem %s353_s29, 128  ;;  %p556_p11 = scmp.lt.s32.totalorder %s353_s29, %s353_s29 }
 0x532   :  { %p552_p10 = scmp.ne.s32.totalorder %s353_s29, %s551_s30  ;;  %p557_p12 = scmp.lt.s32.totalorder %s551_s30, %s551_s30 }
 0x534   :  { %p558_p13 = por %p557_p12, %p556_p11 }
 0x536   :  { %p559_p0 = pnand %p558_p13, %p552_p10 }
 0x5b3   :  { %v332_v17 = vpop.xlane.xlu1 %331 }
 0x5b4   :  { %483 = vrcp.f32 %v332_v17 }
 0x5be   :  { %v484_v18 = vpop.eup %483 }
 0x5bf   :  { %v334_v19 = vmul.f32 %v484_v18, %v482_v16 }
 0x5c1   :  { %335 = vst [vmem:[#allocation8] sm:$0xff] %v334_v19 }
 0x5c2   :  { %562 = shalt.err (!%p559_p0)
}
 0x5c3   :  { %s563_s7 = scalar_lea.hbm %s697_s4, 128 }
 0x5c4   :  { %p564_p1 = scmp.ne.s32.totalorder %s697_s4, %s563_s7  ;;  %p567_p2 = scmp.lt.u32.totalorder %s563_s7, %s697_s4 }
 0x5c6   :  { %p569_p3 = pnand %p567_p2, %p564_p1 }
 0x5c8   :  { %572 = shalt.err (!%p569_p3)
}
 0x5c9   :  { %355 = dma.vmem_to_hbm [thread:$0]  %s353_s29, 128, %s697_s4, [#allocation9]  }
 0x5ca   :  { %577 = dma.done.wait [#allocation4], 128  }
 0x5cb   :  { %578 = vsyncadd [#allocation4], 4294967168 }
 0x5cc   :  { %579 = dma.done.wait [#allocation9], 128  }
 0x5cd   :  { %580 = vsyncadd [#allocation9], 4294967168 }
 0x5ce   :  { %362 = vsyncpa [#allocation3], 1 }
 0x5cf   :  { %363 = vsyncpa [#allocation6], 1 }
 0x5d0   :  { %364 = vsyncpa [#allocation4], 1 }
 0x5d1   :  { %365 = vsyncpa [#allocation9], 1 }

</bundles_post_ra>
